<compile_context>
chip_gen: v7x
topology: tpu7x:2x2x1
jax: 0.10.0
libtpu: 0.0.40
codegen_flags: <defaults>
</compile_context>

<pallas_src>
import jax
import jax.numpy as jnp
from jax.experimental import pallas as pl
from jax.experimental.pallas import tpu as pltpu


def _make_kernel(s_valid):
    """Builds the kernel with the true (unpadded) sequence length baked in."""

    def kernel(x_ref, wt_ref, b_ref, v_ref, o_ref):
        # x_ref : (TB, Sp, F)   wt_ref: (F, Cp)   b_ref: (1, Cp) f32
        # v_ref : (1, Cp) f32   o_ref : (TB, F)
        x = x_ref[...]                                   # native dtype
        TB, Sp, F = x.shape
        Cp = wt_ref.shape[1]

        # h = tanh(x @ Wt + b), accumulated in f32 on the MXU.
        x2 = x.reshape(TB * Sp, F)
        h = jnp.dot(x2, wt_ref[...], preferred_element_type=jnp.float32)
        h = jnp.tanh(h + b_ref[...])                     # (TB*Sp, Cp) f32
        h = h.reshape(TB, Sp, Cp)

        # scores = h . v — VPU multiply + XLU lane reduce (avoids N=1 matmul).
        scores = jnp.sum(h * v_ref[...][None, :, :], axis=-1)   # (TB, Sp) f32

        # Mask padded sequence positions (only active when Sp > s_valid).
        if Sp != s_valid:
            pos = jax.lax.broadcasted_iota(jnp.int32, (TB, Sp), 1)
            scores = jnp.where(pos < s_valid, scores, -jnp.inf)

        # Numerically-stable softmax numerator; normalization is deferred.
        m = jnp.max(scores, axis=-1, keepdims=True)              # (TB, 1)
        e = jnp.exp(scores - m)                                  # (TB, Sp)
        denom = jnp.sum(e, axis=-1, keepdims=True)               # (TB, 1)

        # Unnormalized weighted sum over the sequence axis:
        # VPU multiply + XLU sublane reduce, f32 accumulation.
        acc = jnp.sum(e[:, :, None] * x.astype(jnp.float32), axis=1)   # (TB, F)

        # Exact f32 normalization on the small (TB, F) accumulator.
        o_ref[...] = (acc / denom).astype(o_ref.dtype)

    return kernel


def _vmem_budget_bytes():
    """~60% of this generation's VMEM (v5e/v6e: 128 MiB, v7x: 64 MiB)."""
    cap = 64 * 1024 * 1024                     # conservative (v7x) fallback
    try:
        info = pltpu.get_tpu_info()
        cap = int(getattr(info, "vmem_capacity_bytes", cap))
    except Exception:
        pass
    return (cap * 3) // 5


def _footprint_bytes(tb, S, F, Cp, itemsize):
    """Per-grid-step VMEM footprint for a batch tile of tb rows."""
    x_buf = 2 * tb * S * F * itemsize          # double-buffered x slab
    h_tmp = 2 * tb * S * Cp * 4                # f32 h + h*v temp
    wx_tmp = tb * S * F * 4                    # f32 e*x temp
    out_buf = 2 * tb * F * max(itemsize, 4)    # out double buffer / f32 acc
    small = 4 * tb * S * 4                     # scores / e / max / denom rows
    return x_buf + h_tmp + wx_tmp + out_buf + small


def _choose_batch_tile(B, S, F, Cp, itemsize, budget):
    """Largest legal batch tile whose *full* footprint fits the VMEM budget.

    Legal tiles divide B and are sublane-dense (multiple of 8) or exactly B,
    so the (TB, F) output block never produces masked partial-sublane stores.
    Prefers >= 4 grid points (>= 2 per v7x TensorCore) when that does not
    push the h-matmul M dimension (TB*S) below the 256-row MXU tile height.
    """
    fixed = 2 * F * Cp * itemsize + 4 * Cp * 4     # Wt buffers + bias/v rows
    avail = max(budget - fixed, 0)

    legal = [d for d in range(1, B + 1)
             if B % d == 0 and (d % 8 == 0 or d == B)]
    fits = [d for d in legal if _footprint_bytes(d, S, F, Cp, itemsize) <= avail]
    if not fits:
        return min(legal)          # smallest legal tile; compiler gets the limit

    tb = max(fits)
    m_floor = min(256, tb * S)     # never shrink TB*S below the MXU tile height
    if B // tb < 4:
        better = [d for d in fits if B // d >= 4 and d * S >= m_floor]
        if better:
            tb = max(better)
    return tb


def context_attention(x, w, b, v):
    """x: (B, S, F), w: (C, F), b: (C,), v: (C, 1)  ->  (B, F)"""
    B, S, F = x.shape
    C = w.shape[0]

    # One-time XLA-side layout plumbing (hoisted out of the kernel loop):
    #  * pre-transpose W -> (F, Cp) and cast to activation dtype (MXU native),
    #  * zero-pad C up to a lane-dense multiple of 128 (tanh(0)=0 and padded
    #    chunk-vector entries are 0, so padding is inert),
    #  * zero-pad S up to a sublane multiple of 8 (padded scores masked to
    #    -inf in the kernel, padded x rows are zero),
    #  * keep bias / chunk_vector as f32 rows for the f32 epilogue.
    Cp = ((C + 127) // 128) * 128
    Sp = ((S + 7) // 8) * 8

    wt = jnp.zeros((F, Cp), dtype=x.dtype).at[:, :C].set(w.T.astype(x.dtype))
    b_row = jnp.zeros((1, Cp), dtype=jnp.float32).at[:, :C].set(
        b.astype(jnp.float32).reshape(1, C))
    v_row = jnp.zeros((1, Cp), dtype=jnp.float32).at[:, :C].set(
        v.astype(jnp.float32).reshape(1, C))

    x_in = x
    if Sp != S:
        x_in = jnp.zeros((B, Sp, F), dtype=x.dtype).at[:, :S, :].set(x)

    budget = _vmem_budget_bytes()
    TB = _choose_batch_tile(B, Sp, F, Cp, x.dtype.itemsize, budget)
    grid = (B // TB,)

    kernel = _make_kernel(S)

    return pl.pallas_call(
        kernel,
        out_shape=jax.ShapeDtypeStruct((B, F), x.dtype),
        grid_spec=pltpu.PrefetchScalarGridSpec(
            num_scalar_prefetch=0,
            grid=grid,
            in_specs=[
                pl.BlockSpec((TB, Sp, F), lambda i: (i, 0, 0)),   # x slab
                pl.BlockSpec((F, Cp), lambda i: (0, 0)),          # Wt (resident)
                pl.BlockSpec((1, Cp), lambda i: (0, 0)),          # bias row
                pl.BlockSpec((1, Cp), lambda i: (0, 0)),          # chunk vector row
            ],
            out_specs=pl.BlockSpec((TB, F), lambda i: (i, 0)),
        ),
        compiler_params=pltpu.CompilerParams(
            dimension_semantics=("parallel",),
            vmem_limit_bytes=budget),
    )(x_in, wt, b_row, v_row)


def _reference(x, w, b, v):
    # Pure-JAX reference of the PyTorch forward.
    B, S, F = x.shape
    h = jnp.tanh(x.reshape(-1, F) @ w.T + b).reshape(B, S, -1)
    scores = h @ v                                   # (B, S, 1)
    attn = jax.nn.softmax(scores, axis=1)            # softmax over seq dim
    return jnp.sum(x * attn, axis=1)                 # (B, F)


if __name__ == "__main__":
    # Small shapes consistent with the module.
    B, S, F, C = 2, 8, 32, 16   # batch, seq_len, input_feature, context_size

    key = jax.random.PRNGKey(0)
    kx, kw, kv = jax.random.split(key, 3)

    x = jax.random.normal(kx, (B, S, F), dtype=jnp.float32)

    # Deterministic parameter init mirroring the module's __init__:
    #   Linear weight: xavier_uniform  (bound = sqrt(6 / (fan_in + fan_out)))
    #   Linear bias:   zeros
    #   chunk_vector:  uniform(0, 1)
    bound = (6.0 / (F + C)) ** 0.5
    w = jax.random.uniform(kw, (C, F), minval=-bound, maxval=bound,
                           dtype=jnp.float32)
    b = jnp.zeros((C,), dtype=jnp.float32)
    v = jax.random.uniform(kv, (C, 1), minval=0.0, maxval=1.0,
                           dtype=jnp.float32)

    out = context_attention(x, w, b, v)
    out = jax.block_until_ready(out)

    ref = _reference(x, w, b, v)
    assert out.shape == (B, F)
    # Exact f32 normalization now — tolerance only covers EUP tanh/exp vs XLA.
    assert jnp.allclose(out, ref, atol=1e-4, rtol=1e-4), \
        float(jnp.max(jnp.abs(out - ref)))

    print("KERNEL_OK")
</pallas_src>

<mosaic_0001>
module attributes {stable_mosaic.version = 11 : i64} {
  func.func @kernel(%arg0: i32, %arg1: memref<2x8x32xf32, #tpu.memory_space<vmem>>, %arg2: memref<32x128xf32, #tpu.memory_space<vmem>>, %arg3: memref<1x128xf32, #tpu.memory_space<vmem>>, %arg4: memref<1x128xf32, #tpu.memory_space<vmem>>, %arg5: memref<2x32xf32, #tpu.memory_space<vmem>>) attributes {dimension_semantics = [#tpu.dimension_semantics<parallel>], iteration_bounds = array<i64: 1>, scalar_prefetch = 0 : i64, scratch_operands = 0 : i64, tpu.core_type = #tpu.core_type<tc>, window_params = [{transform_indices = @transform_0, window_bounds = array<i64: 2, 8, 32>}, {pipeline_mode = #tpu.pipeline_mode<synchronous>, transform_indices = @transform_1, window_bounds = array<i64: 32, 128>}, {pipeline_mode = #tpu.pipeline_mode<synchronous>, transform_indices = @transform_2, window_bounds = array<i64: 1, 128>}, {pipeline_mode = #tpu.pipeline_mode<synchronous>, transform_indices = @transform_3, window_bounds = array<i64: 1, 128>}, {transform_indices = @transform_4, window_bounds = array<i64: 2, 32>}]} {
    %c0 = arith.constant 0 : index
    %c0_0 = arith.constant 0 : index
    %c0_1 = arith.constant 0 : index
    %0 = vector.load %arg1[%c0, %c0_0, %c0_1] : memref<2x8x32xf32, #tpu.memory_space<vmem>>, vector<2x8x32xf32>
    %1 = vector.shape_cast %0 : vector<2x8x32xf32> to vector<16x32xf32>
    %c0_2 = arith.constant 0 : index
    %c0_3 = arith.constant 0 : index
    %2 = vector.load %arg2[%c0_2, %c0_3] : memref<32x128xf32, #tpu.memory_space<vmem>>, vector<32x128xf32>
    %cst = arith.constant dense<0.000000e+00> : vector<16x128xf32>
    %3 = tpu.matmul %1, %2, %cst {dimension_numbers = #tpu.dot_dimension_numbers<[1], [0], [0], [1], [0, 0, 1, 1], [], []>} : vector<16x32xf32>, vector<32x128xf32>, vector<16x128xf32> -> vector<16x128xf32>
    %c0_4 = arith.constant 0 : index
    %c0_5 = arith.constant 0 : index
    %4 = vector.load %arg3[%c0_4, %c0_5] : memref<1x128xf32, #tpu.memory_space<vmem>>, vector<1x128xf32>
    %5 = vector.broadcast %4 : vector<1x128xf32> to vector<16x128xf32>
    %6 = arith.addf %3, %5 : vector<16x128xf32>
    %7 = math.tanh %6 : vector<16x128xf32>
    %8 = vector.shape_cast %7 : vector<16x128xf32> to vector<2x8x128xf32>
    %c0_6 = arith.constant 0 : index
    %c0_7 = arith.constant 0 : index
    %9 = vector.load %arg4[%c0_6, %c0_7] : memref<1x128xf32, #tpu.memory_space<vmem>>, vector<1x128xf32>
    %10 = vector.shape_cast %9 : vector<1x128xf32> to vector<1x1x128xf32>
    %11 = vector.broadcast %10 : vector<1x1x128xf32> to vector<2x8x128xf32>
    %12 = arith.mulf %8, %11 : vector<2x8x128xf32>
    %cst_8 = arith.constant dense<0.000000e+00> : vector<2x8xf32>
    %13 = vector.multi_reduction <add>, %12, %cst_8 [2] : vector<2x8x128xf32> to vector<2x8xf32>
    %cst_9 = arith.constant dense<0xFF800000> : vector<2xf32>
    %14 = vector.multi_reduction <maximumf>, %13, %cst_9 [1] : vector<2x8xf32> to vector<2xf32>
    %15 = vector.shape_cast %14 : vector<2xf32> to vector<2x1xf32>
    %16 = vector.broadcast %15 : vector<2x1xf32> to vector<2x8xf32>
    %17 = arith.subf %13, %16 : vector<2x8xf32>
    %18 = math.exp %17 : vector<2x8xf32>
    %cst_10 = arith.constant dense<0.000000e+00> : vector<2xf32>
    %19 = vector.multi_reduction <add>, %18, %cst_10 [1] : vector<2x8xf32> to vector<2xf32>
    %20 = vector.shape_cast %19 : vector<2xf32> to vector<2x1xf32>
    %21 = vector.shape_cast %18 : vector<2x8xf32> to vector<2x8x1xf32>
    %22 = vector.broadcast %21 : vector<2x8x1xf32> to vector<2x8x32xf32>
    %23 = arith.mulf %22, %0 : vector<2x8x32xf32>
    %cst_11 = arith.constant dense<0.000000e+00> : vector<2x32xf32>
    %24 = vector.multi_reduction <add>, %23, %cst_11 [1] : vector<2x8x32xf32> to vector<2x32xf32>
    %25 = vector.broadcast %20 : vector<2x1xf32> to vector<2x32xf32>
    %26 = arith.divf %24, %25 : vector<2x32xf32>
    %c0_12 = arith.constant 0 : index
    %c0_13 = arith.constant 0 : index
    %27 = vector.load %arg5[%c0_12, %c0_13] : memref<2x32xf32, #tpu.memory_space<vmem>>, vector<2x32xf32>
    tpu.vector_store %arg5[%c0_12, %c0_13], %26 {strides = array<i32>} : memref<2x32xf32, #tpu.memory_space<vmem>>, vector<2x32xf32>,
    return
  }
  func.func @transform_0(%arg0: i32) -> (i32, i32, i32) {
    %c0_i32 = arith.constant 0 : i32
    %c0_i32_0 = arith.constant 0 : i32
    %c0_i32_1 = arith.constant 0 : i32
    return %arg0, %c0_i32, %c0_i32_0 : i32, i32, i32
  }
  func.func @transform_1(%arg0: i32) -> (i32, i32) {
    %c0_i32 = arith.constant 0 : i32
    %c0_i32_0 = arith.constant 0 : i32
    %c0_i32_1 = arith.constant 0 : i32
    return %c0_i32, %c0_i32_0 : i32, i32
  }
  func.func @transform_2(%arg0: i32) -> (i32, i32) {
    %c0_i32 = arith.constant 0 : i32
    %c0_i32_0 = arith.constant 0 : i32
    %c0_i32_1 = arith.constant 0 : i32
    return %c0_i32, %c0_i32_0 : i32, i32
  }
  func.func @transform_3(%arg0: i32) -> (i32, i32) {
    %c0_i32 = arith.constant 0 : i32
    %c0_i32_0 = arith.constant 0 : i32
    %c0_i32_1 = arith.constant 0 : i32
    return %c0_i32, %c0_i32_0 : i32, i32
  }
  func.func @transform_4(%arg0: i32) -> (i32, i32) {
    %c0_i32 = arith.constant 0 : i32
    %c0_i32_0 = arith.constant 0 : i32
    return %arg0, %c0_i32 : i32, i32
  }
}

</mosaic_0001>

<bundles_post_ra>
// kernel: tpu_custom_call.1
= control target key start
LH: loop header
LB: loop body
LE: loop exit
PB: predicated region body
PF: predicated region fallthrough
CT: control target
= control target key end

     0   :  { %9 = vsyncpa [#allocation3], 0  ;;  %s465_s0 = inlined_call_operand.hbm [shape: f32[2,8,32], index: 0, kind: input, shape index: {}]   ;;  %s466_s1 = inlined_call_operand.hbm [shape: f32[32,128], index: 1, kind: input, shape index: {}]   ;;  %s467_s2 = inlined_call_operand.vmem [shape: f32[1,128], index: 2, kind: input, shape index: {}]   ;;  %s468_s3 = inlined_call_operand.vmem [shape: f32[1,128], index: 3, kind: input, shape index: {}]   ;;  %s469_s4 = inlined_call_operand.hbm [shape: f32[2,32], index: 4, kind: output, shape index: {}]  }
   0x1   :  { %10 = vsyncpa [#allocation6], 0 }
   0x2   :  { %11 = vsyncpa [#allocation4], 0  ;;  %s383_s15 = smov [#allocation2]   ;;  %s311_s19 = scalar_lea.hbm %s465_s0, 256 }
   0x3   :  { %s17_s16 = sshll.u32 %s383_s15, 4  ;;  %p312_p0 = scmp.ne.s32.totalorder %s465_s0, %s311_s19  ;;  %s18_s16 = int_to_ptr.vmem [resolvable:$true] %s17_s16 }
   0x4   :  { %p315_p1 = scmp.lt.u32.totalorder %s311_s19, %s465_s0 }
   0x6   :  { %p317_p2 = pnand %p315_p1, %p312_p0 }
   0x8   :  { %320 = shalt.err (!%p317_p2)
}
   0x9   :  { %s321_s24 = scalar_lea.vmem %s18_s16, 256  ;;  %p326_p4 = scmp.lt.s32.totalorder %s18_s16, %s18_s16 }
   0xa   :  { %p322_p3 = scmp.ne.s32.totalorder %s18_s16, %s321_s24  ;;  %p327_p5 = scmp.lt.s32.totalorder %s321_s24, %s321_s24 }
   0xc   :  { %p328_p6 = por %p327_p5, %p326_p4 }
   0xe   :  { %p329_p7 = pnand %p328_p6, %p322_p3 }
  0x10   :  { %332 = shalt.err (!%p329_p7)
}
  0x11   :  { %s384_s25 = smov 128   ;;  %s385_s26 = smov 8  }
  0x12   :  { %23 = dma.hbm_to_vmem [thread:$0]  %s465_s0, 256, %s18_s16, [#allocation3], %s384_s25, %s384_s25, %s385_s26  }
  0x13   :  { %s386_s29 = smov [#allocation5]   ;;  %s333_s7 = scalar_lea.hbm %s466_s1, 512 }
  0x14   :  { %s29_s30 = sshll.u32 %s386_s29, 4  ;;  %p334_p8 = scmp.ne.s32.totalorder %s466_s1, %s333_s7  ;;  %s30_s30 = int_to_ptr.vmem [resolvable:$true] %s29_s30 }
  0x15   :  { %p337_p9 = scmp.lt.u32.totalorder %s333_s7, %s466_s1 }
  0x17   :  { %p339_p10 = pnand %p337_p9, %p334_p8 }
  0x19   :  { %342 = shalt.err (!%p339_p10)
}
  0x1a   :  { %s343_s12 = scalar_lea.vmem %s30_s30, 512  ;;  %p348_p12 = scmp.lt.s32.totalorder %s30_s30, %s30_s30 }
  0x1b   :  { %p344_p11 = scmp.ne.s32.totalorder %s30_s30, %s343_s12  ;;  %p349_p13 = scmp.lt.s32.totalorder %s343_s12, %s343_s12 }
  0x1d   :  { %p350_p0 = por %p349_p13, %p348_p12 }
  0x1f   :  { %p351_p1 = pnand %p350_p0, %p344_p11 }
  0x21   :  { %354 = shalt.err (!%p351_p1)
}
  0x22   :  { %35 = dma.hbm_to_vmem [thread:$0]  %s466_s1, 512, %s30_s30, [#allocation6], %s384_s25, %s384_s25, %s385_s26  }
  0x23   :  { %377 = dma.done.wait [#allocation3], 256  }
  0x24   :  { %378 = vsyncadd [#allocation3], 4294967040 }
  0x25   :  { %379 = dma.done.wait [#allocation6], 512  }
  0x26   :  { %380 = vsyncadd [#allocation6], 4294966784  ;;  %vm59_vm0 = vcmask 261120   ;;  %v48_v0 = vld [vmem:[#allocation5] sm:$0xff]  ;;  %v49_v1 = vld [vmem:[#allocation5 + $0x8] sm:$0xff]  ;;  %v158_v18 = vlaneseq  ;;  %vm168_vm1 = vcmask 1041409  }
  0x27   :  { %v50_v2 = vld [vmem:[#allocation5 + $0x10] sm:$0xff]  ;;  %v283_v3 = vpack.c.bf16 %v49_v1, %v48_v0  ;;  %v51_v4 = vld [vmem:[#allocation5 + $0x18] sm:$0xff]  ;;  %vm171_vm2 = vcmask 58368   ;;  %v387_v28 = vmov 0   ;;  %vm244_vm3 = vcmask 254976  }
  0x28   :  { %v46_v5 = vld [vmem:[#allocation2] sm:$0xff]  ;;  %v287_v6 = vpack.c.bf16 %v51_v4, %v50_v2  ;;  %v47_v7 = vld [vmem:[#allocation2 + $0x8] sm:$0xff]  ;;  %v159_v19 = vand.u32 127, %v158_v18  ;;  %v161_v20 = vshrl.u32 %v158_v18, 7  ;;  %298 = vset.pattern.permute.xlu0 %v387_v28  ;;  %297 = vset.pattern.permute.xlu1 %v387_v28 }
  0x29   :  { %280 = vmatprep.mubr.msk.f32.mxu0 %vm59_vm0, %v46_v5  ;;  %284 = vmatprep.subr.bf16.mxu0 %v283_v3  ;;  %v262_v8 = vld [vmem:[%s467_s2] ss:$0 sm:$0xff]  ;;  %s388_s2 = smov [#allocation7]  }
  0x2a   :  { %286 = vmatpush3.bf16.msra.mxu0 %v283_v3  ;;  %v265_v13 = vld [vmem:[%s468_s3] ss:$0 sm:$0xff]  ;;  %v162_v22 = vsub.s32 %v159_v19, %v161_v20  ;;  %v178_v29 = vsub.s32 0, %v161_v20  ;;  %v182_v30 = vsub.s32 1, %v161_v20  ;;  %s252_s3 = sshll.u32 %s388_s2, 4  ;;  %s253_s3 = int_to_ptr.vmem [resolvable:$true] %s252_s3 }
  0x2b   :  { %288 = vmatprep.subr.bf16.mxu0 %v287_v6  ;;  %s355_s17 = scalar_lea.vmem %s253_s3, 32  ;;  %p360_p3 = scmp.lt.s32.totalorder %s253_s3, %s253_s3 }
  0x2c   :  { %p356_p2 = scmp.ne.s32.totalorder %s253_s3, %s355_s17  ;;  %p361_p4 = scmp.lt.s32.totalorder %s355_s17, %s355_s17 }
  0x2e   :  { %290 = vmatpush3.bf16.msra.mxu0 %v287_v6  ;;  %p362_p5 = por %p361_p4, %p360_p3 }
  0x30   :  { %p363_p6 = pnand %p362_p5, %p356_p2 }
  0x31   :  { %281 = vmatmul.mubr.msk.f32.vlgmr.msra.gmra.mrb[0].mxu0 %vm59_vm0, %v47_v7 }
 0x104   :  { %v282_v9 = vpop.f32.mrb[0].mxu0 }
 0x105   :  { %v132_v10 = vpop.f32.mrb[1].mxu0  ;;  %v138_v11 = vadd.f32 %v282_v9, %v262_v8 }
 0x106   :  { %v133_v12 = vadd.f32 %v262_v8, %v132_v10 }
 0x108   :  { %299 = vtanh.f32 %v133_v12 }
 0x109   :  { %301 = vtanh.f32 %v138_v11 }
 0x112   :  { %v300_v14 = vpop.eup %299 }
 0x113   :  { %v150_v15 = vmul.f32 %v300_v14, %v265_v13  ;;  %v302_v16 = vpop.eup %301 }
 0x114   :  { %v151_v17 = vmul.f32 %v302_v16, %v265_v13 }
 0x115   :  { %152 = vadd.xlane.f32.xlu0 %v150_v15 }
 0x119   :  { %154 = vadd.xlane.f32.xlu0 %v151_v17 }
 0x1a2   :  { %v153_v21 = vpop.xlane.xlu0 %152 }
 0x1a3   :  { %v163_v24 = vrot.slane %v153_v21, %v162_v22 }
 0x1a6   :  { %v155_v23 = vpop.xlane.xlu0 %154 }
 0x1a7   :  { %v167_v25 = vrot.slane %v155_v23, %v162_v22 }
 0x1a9   :  { %v169_v26 = vsel %vm168_vm1, %v167_v25, %v163_v24 }
 0x1aa   :  { %v172_v27 = vsel %vm171_vm2, %v169_v26, -inf }
 0x1ab   :  { %173 = vmax.xlane.f32.xlu1 %v172_v27 }
 0x238   :  { %v174_v31 = vpop.xlane.xlu1 %173 }
 0x239   :  { %v179_v32 = vrot.slane %v174_v31, %v178_v29  ;;  %v183_v33 = vrot.slane %v174_v31, %v182_v30 }
 0x23b   :  { %v186_v34 = vsub.f32 %v153_v21, %v179_v32  ;;  %v187_v35 = vsub.f32 %v155_v23, %v183_v33 }
 0x23d   :  { %v188_v36 = vmul.f32 1.442695, %v186_v34  ;;  %v190_v37 = vmul.f32 1.442695, %v187_v35 }
 0x23f   :  { %303 = vpow2.f32 %v188_v36 }
 0x240   :  { %305 = vpow2.f32 %v190_v37 }
 0x249   :  { %v304_v38 = vpop.eup %303 }
 0x24a   :  { %v306_v39 = vpop.eup %305  ;;  %195 = vperm.xlu1 %297, %v304_v38  }
 0x24b   :  { %198 = vperm.xlu0 %298, %v306_v39  }
 0x2c9   :  { %v196_v40 = vpop.permute.xlu1 %195 }
 0x2ca   :  { %v199_v41 = vpop.permute.xlu0 %198  ;;  %v203_v42 = vrot.slane %v196_v40, %v162_v22  ;;  %v215_v47 = vmul.f32 %v196_v40, %v46_v5 }
 0x2cb   :  { %v207_v43 = vrot.slane %v199_v41, %v162_v22  ;;  %v216_v46 = vmul.f32 %v199_v41, %v47_v7 }
 0x2cc   :  { %v217_v49 = vsel %vm59_vm0, %v215_v47, 0.0 }
 0x2cd   :  { %v208_v44 = vsel %vm168_vm1, %v207_v43, %v203_v42  ;;  %v224_v48 = vsel %vm59_vm0, %v216_v46, 0.0  ;;  %v218_v51 = vrot.slane %v217_v49, 4 }
 0x2ce   :  { %v210_v45 = vsel %vm171_vm2, %v208_v44, 0.0  ;;  %v225_v50 = vrot.slane %v224_v48, 4 }
 0x2cf   :  { %211 = vadd.xlane.f32.xlu1 %v210_v45  ;;  %v219_v53 = vadd.f32 %v218_v51, %v217_v49 }
 0x2d0   :  { %v226_v52 = vadd.f32 %v225_v50, %v224_v48 }
 0x2d1   :  { %v220_v57 = vrot.slane %v219_v53, 2 }
 0x2d2   :  { %v227_v54 = vrot.slane %v226_v52, 2 }
 0x2d3   :  { %v221_v59 = vadd.f32 %v220_v57, %v219_v53 }
 0x2d4   :  { %v228_v58 = vadd.f32 %v227_v54, %v226_v52 }
 0x2d5   :  { %v222_v61 = vrot.slane %v221_v59, 1 }
 0x2d6   :  { %v229_v60 = vrot.slane %v228_v58, 1 }
 0x2d7   :  { %v223_v1 = vadd.f32 %v222_v61, %v221_v59 }
 0x2d8   :  { %v230_v63 = vadd.f32 %v229_v60, %v228_v58 }
 0x35c   :  { %v212_v55 = vpop.xlane.xlu1 %211 }
 0x35d   :  { %v232_v56 = vrot.slane %v212_v55, 1  ;;  %307 = vrcp.f32 %v212_v55 }
 0x35f   :  { %309 = vrcp.f32 %v232_v56 }
 0x367   :  { %v308_v62 = vpop.eup %307 }
 0x368   :  { %v236_v3 = vmul.f32 %v308_v62, %v223_v1 }
 0x369   :  { %v310_v0 = vpop.eup %309 }
 0x36a   :  { %v238_v2 = vmul.f32 %v310_v0, %v230_v63 }
 0x36c   :  { %v241_v4 = vrot.slane %v238_v2, 7 }
 0x36e   :  { %v242_v5 = vsel %vm168_vm1, %v241_v4, %v236_v3 }
 0x36f   :  { %245 = vst.msk [vmem:[#allocation7] sm:$0x3] %vm244_vm3, %v242_v5 }
 0x370   :  { %366 = shalt.err (!%p363_p6)
}
 0x371   :  { %s367_s20 = scalar_lea.hbm %s469_s4, 32 }
 0x372   :  { %p368_p7 = scmp.ne.s32.totalorder %s469_s4, %s367_s20  ;;  %p371_p8 = scmp.lt.u32.totalorder %s367_s20, %s469_s4 }
 0x374   :  { %p373_p9 = pnand %p371_p8, %p368_p7 }
 0x376   :  { %376 = shalt.err (!%p373_p9)
}
 0x377   :  { %255 = dma.vmem_to_hbm [thread:$0]  %s253_s3, 32, %s469_s4, [#allocation4]  }
 0x378   :  { %381 = dma.done.wait [#allocation4], 32  }
 0x379   :  { %382 = vsyncadd [#allocation4], 4294967264 }
 0x37a   :  { %259 = vsyncpa [#allocation3], 1 }
 0x37b   :  { %260 = vsyncpa [#allocation6], 1 }
 0x37c   :  { %261 = vsyncpa [#allocation4], 1 }

</bundles_post_ra>
